<compile_context>
chip_gen: v6e
topology: v6e:2x2x1
jax: 0.10.0
libtpu: 0.0.40
codegen_flags: <defaults>
</compile_context>

<pallas_src>
import functools

import jax
import jax.numpy as jnp
from jax import lax
from jax.experimental import pallas as pl
from jax.experimental.pallas import tpu as pltpu


_NT = (((1,), (1,)), ((), ()))   # dot_general dims: contract last axes (A @ B.T)


def _round_up(x, m):
    return (x + m - 1) // m * m


def _vmem_limit_bytes(B, H, E):
    """Rough single-tile VMEM budget from padded-tile sizes, clamped to [32,64] MiB."""
    def pad(r, c, bpe=4):
        return _round_up(max(r, 1), 8) * _round_up(max(c, 1), 128) * bpe
    n2 = 2 * B
    est = (4 * pad(B, H)                    # a, b, c, doc
           + 2 * pad(n2, H)                 # abn scratch + bf16 operand copies
           + 3 * pad(n2, n2)                # sim / exp temporaries
           + 6 * pad(B, max(E, H))          # projection / softmax temporaries
           + 4 * pad(B, B)                  # funk_ab/ba, dist, sim_h
           + pad(H, H) + pad(H, E) + 8 * pad(1, max(H, E)))
    return int(min(max(2 * est, 32 << 20), 64 << 20))


def _loss_kernel(a_ref, b_ref, c_ref, doc_ref,
                 w1_ref, b1_ref, g1_ref, be1_ref,
                 w2_ref, b2_ref, g2_ref, be2_ref,
                 out_ref, abn_ref, *,
                 batch_size, simcse_temperature, hilbert_temperature,
                 lambda_value):
    SMALL = 1e-12
    LARGE = 1.0e9
    BN_EPS = 1e-5
    B = batch_size
    n2 = 2 * B
    inv_t = 1.0 / simcse_temperature
    inv_th = 1.0 / hilbert_temperature

    # ---------------- SimCSE branch ----------------
    a = a_ref[...]
    b = b_ref[...]
    an = a * lax.rsqrt(jnp.sum(a * a, axis=1, keepdims=True) + SMALL)    # [B,H]
    bn = b * lax.rsqrt(jnp.sum(b * b, axis=1, keepdims=True) + SMALL)    # [B,H]

    # Stack normalized halves into a (2B, H) VMEM scratch (no HBM concat in the
    # wrapper).  B is a multiple of 8 in the test -> sublane-aligned stores.
    abn_ref[:B, :] = an
    abn_ref[B:, :] = bn
    abn = abn_ref[...]

    # bf16 operands, f32 accumulation; 1/T folded into the LHS so the MXU
    # output is already the final logit matrix.
    lhs = (abn * inv_t).astype(jnp.bfloat16)
    rhs = abn.astype(jnp.bfloat16)
    sim = lax.dot_general(lhs, rhs, _NT, preferred_element_type=jnp.float32)  # [2B,2B]

    # Diagonal mask: single select, no eye materialization.
    row_ids = lax.broadcasted_iota(jnp.int32, (n2, n2), 0)
    col_ids = lax.broadcasted_iota(jnp.int32, (n2, n2), 1)
    sim = jnp.where(row_ids == col_ids, -LARGE, sim)

    row_max = jnp.max(sim, axis=1, keepdims=True)
    lse = jnp.log(jnp.sum(jnp.exp(sim - row_max), axis=1, keepdims=True)) + row_max

    # labels = [B..2B-1, 0..B-1]: target logit of row i (and of row i+B) is
    # cos(a_i, b_i)/T -> cheap [B,H] row-wise dot instead of a [2B,2B] mask.
    tgt = jnp.sum(an * bn, axis=1, keepdims=True) * inv_t                # [B,1]
    simcse_ce = (jnp.sum(lse, axis=0, keepdims=True)
                 - 2.0 * jnp.sum(tgt, axis=0, keepdims=True)) * (1.0 / n2)   # (1,1)

    # ------- Projection MLP (Linear -> BN -> ReLU -> Linear -> BN) -------
    w1 = w1_ref[...]; b1 = b1_ref[...]; g1 = g1_ref[...]; be1 = be1_ref[...]
    w2 = w2_ref[...]; b2 = b2_ref[...]; g2 = g2_ref[...]; be2 = be2_ref[...]

    def project(x):
        h = jnp.dot(x, w1, preferred_element_type=jnp.float32) + b1      # [B,H]
        mu = jnp.mean(h, axis=0, keepdims=True)
        var = jnp.mean((h - mu) * (h - mu), axis=0, keepdims=True)       # biased (train-mode BN)
        h = (h - mu) * lax.rsqrt(var + BN_EPS) * g1 + be1
        h = jnp.maximum(h, 0.0)
        z = jnp.dot(h, w2, preferred_element_type=jnp.float32) + b2      # [B,E]
        mu2 = jnp.mean(z, axis=0, keepdims=True)
        var2 = jnp.mean((z - mu2) * (z - mu2), axis=0, keepdims=True)
        return (z - mu2) * lax.rsqrt(var2 + BN_EPS) * g2 + be2

    def softmax1(z):
        m = jnp.max(z, axis=1, keepdims=True)
        e = jnp.exp(z - m)
        return e * pl.reciprocal(jnp.sum(e, axis=1, keepdims=True), approx=True)

    sc = softmax1(project(c_ref[...]))                                    # [B,E]
    sd = softmax1(project(doc_ref[...]))                                  # [B,E]

    # ---------------- Hilbert distance branch ----------------
    inv_sc = pl.reciprocal(sc, approx=True)
    inv_sd = pl.reciprocal(sd, approx=True)
    funk_ab = lax.dot_general(sc, inv_sd, _NT, preferred_element_type=jnp.float32)  # [B,B]
    funk_ba = lax.dot_general(sd, inv_sc, _NT, preferred_element_type=jnp.float32)  # [B,B]
    dist = jnp.log(funk_ab * funk_ba) * inv_th
    sim_h = pl.reciprocal(dist + 1.0, approx=True)

    rmax = jnp.max(sim_h, axis=1, keepdims=True)
    lse_h = jnp.log(jnp.sum(jnp.exp(sim_h - rmax), axis=1, keepdims=True)) + rmax

    # Diagonal target via [B,E] row-wise dots (no [B,B] iota mask / reduce).
    d1 = jnp.sum(sc * inv_sd, axis=1, keepdims=True)                      # diag(funk_ab)
    d2 = jnp.sum(sd * inv_sc, axis=1, keepdims=True)                      # diag(funk_ba)
    tgt_h = pl.reciprocal(jnp.log(d1 * d2) * inv_th + 1.0, approx=True)   # [B,1]
    hilbert_ce = (jnp.sum(lse_h, axis=0, keepdims=True)
                  - jnp.sum(tgt_h, axis=0, keepdims=True)) * (1.0 / B)    # (1,1)

    out_ref[...] = lambda_value * simcse_ce + hilbert_ce


def simcse_hilbert_loss_2branch(emb_a, emb_b, emb_c, emb_doc, params, *,
                                simcse_temperature, hilbert_temperature,
                                lambda_value):
    """Wrapper: single-tile pallas_call, a/b passed separately (no HBM concat)."""
    B, H = emb_a.shape
    E = params["w2"].shape[1]

    kernel = functools.partial(
        _loss_kernel,
        batch_size=B,
        simcse_temperature=simcse_temperature,
        hilbert_temperature=hilbert_temperature,
        lambda_value=lambda_value,
    )

    vmem = pl.BlockSpec(memory_space=pltpu.MemorySpace.VMEM)
    out = pl.pallas_call(
        kernel,
        out_shape=jax.ShapeDtypeStruct((1, 1), jnp.float32),
        in_specs=[vmem] * 12,
        out_specs=vmem,
        scratch_shapes=[pltpu.VMEM((2 * B, H), jnp.float32)],
        compiler_params=pltpu.CompilerParams(
            vmem_limit_bytes=_vmem_limit_bytes(B, H, E)),
    )(emb_a, emb_b, emb_c, emb_doc,
      params["w1"], params["b1"], params["g1"], params["be1"],
      params["w2"], params["b2"], params["g2"], params["be2"])
    return out[0, 0]


def _reference_loss(emb_a, emb_b, emb_c, emb_doc, params, *,
                    simcse_temperature, hilbert_temperature, lambda_value):
    """Plain-JAX reference mirroring the PyTorch forward (for sanity check)."""
    SMALL, LARGE, BN_EPS = 1e-12, 1.0e9, 1e-5
    B = emb_a.shape[0]

    ab = jnp.concatenate([emb_a, emb_b], axis=0)
    nrm = jnp.sqrt(jnp.sum(ab ** 2, axis=1) + SMALL)
    sim = (ab @ ab.T) / (nrm[:, None] * nrm[None, :]) / simcse_temperature
    sim = sim - LARGE * jnp.eye(2 * B)
    labels = jnp.concatenate([jnp.arange(B) + B, jnp.arange(B)])
    logp = sim - jax.scipy.special.logsumexp(sim, axis=1, keepdims=True)
    simcse_ce = -jnp.mean(logp[jnp.arange(2 * B), labels])

    def project(x):
        h = x @ params["w1"] + params["b1"]
        mu, var = jnp.mean(h, 0), jnp.var(h, 0)
        h = (h - mu) / jnp.sqrt(var + BN_EPS) * params["g1"] + params["be1"]
        h = jnp.maximum(h, 0.0)
        z = h @ params["w2"] + params["b2"]
        mu2, var2 = jnp.mean(z, 0), jnp.var(z, 0)
        return (z - mu2) / jnp.sqrt(var2 + BN_EPS) * params["g2"] + params["be2"]

    sc = jax.nn.softmax(project(emb_c), axis=1)
    sd = jax.nn.softmax(project(emb_doc), axis=1)
    dist = jnp.log((sc @ (1.0 / sd).T) * (sd @ (1.0 / sc).T)) / hilbert_temperature
    sim_h = 1.0 / (dist + 1.0)
    logp_h = sim_h - jax.scipy.special.logsumexp(sim_h, axis=1, keepdims=True)
    hilbert_ce = -jnp.mean(logp_h[jnp.arange(B), jnp.arange(B)])
    return lambda_value * simcse_ce + hilbert_ce


if __name__ == "__main__":
    B, H, E = 8, 32, 16
    simcse_temperature = 0.05
    hilbert_temperature = 1.0
    lambda_value = 0.5

    key = jax.random.PRNGKey(0)
    ka, kb, kc, kd, kw1, kb1, kw2, kb2 = jax.random.split(key, 8)

    emb_a = jax.random.normal(ka, (B, H), jnp.float32)
    emb_b = jax.random.normal(kb, (B, H), jnp.float32)
    emb_c = jax.random.normal(kc, (B, H), jnp.float32)
    emb_doc = jax.random.normal(kd, (B, H), jnp.float32)

    # Deterministic synthetic projection parameters (PyTorch-default-style BN
    # affine: gamma=1, beta=0).  Biases/scales are stored as (1, F) rows.
    params = {
        "w1": jax.random.normal(kw1, (H, H), jnp.float32) * (1.0 / jnp.sqrt(H)),
        "b1": (jax.random.normal(kb1, (1, H), jnp.float32) * 0.01),
        "g1": jnp.ones((1, H), jnp.float32),
        "be1": jnp.zeros((1, H), jnp.float32),
        "w2": jax.random.normal(kw2, (H, E), jnp.float32) * (1.0 / jnp.sqrt(H)),
        "b2": (jax.random.normal(kb2, (1, E), jnp.float32) * 0.01),
        "g2": jnp.ones((1, E), jnp.float32),
        "be2": jnp.zeros((1, E), jnp.float32),
    }

    loss = simcse_hilbert_loss_2branch(
        emb_a, emb_b, emb_c, emb_doc, params,
        simcse_temperature=simcse_temperature,
        hilbert_temperature=hilbert_temperature,
        lambda_value=lambda_value)
    loss = jax.block_until_ready(loss)

    ref = _reference_loss(
        emb_a, emb_b, emb_c, emb_doc, params,
        simcse_temperature=simcse_temperature,
        hilbert_temperature=hilbert_temperature,
        lambda_value=lambda_value)
    ref = jax.block_until_ready(ref)

    assert jnp.isfinite(loss), "kernel produced non-finite loss"
    assert jnp.allclose(loss, ref, rtol=2e-2, atol=2e-2), (loss, ref)
    print("KERNEL_OK")
</pallas_src>

<mosaic_0001>
module attributes {stable_mosaic.version = 11 : i64} {
  func.func @_loss_kernel(%arg0: memref<8x32xf32, #tpu.memory_space<vmem>>, %arg1: memref<8x32xf32, #tpu.memory_space<vmem>>, %arg2: memref<8x32xf32, #tpu.memory_space<vmem>>, %arg3: memref<8x32xf32, #tpu.memory_space<vmem>>, %arg4: memref<32x32xf32, #tpu.memory_space<vmem>>, %arg5: memref<1x32xf32, #tpu.memory_space<vmem>>, %arg6: memref<1x32xf32, #tpu.memory_space<vmem>>, %arg7: memref<1x32xf32, #tpu.memory_space<vmem>>, %arg8: memref<32x16xf32, #tpu.memory_space<vmem>>, %arg9: memref<1x16xf32, #tpu.memory_space<vmem>>, %arg10: memref<1x16xf32, #tpu.memory_space<vmem>>, %arg11: memref<1x16xf32, #tpu.memory_space<vmem>>, %arg12: memref<1x1xf32, #tpu.memory_space<vmem>>, %arg13: memref<16x32xf32, #tpu.memory_space<vmem>>) attributes {dimension_semantics = [], scalar_prefetch = 0 : i64, scratch_operands = 1 : i64, tpu.core_type = #tpu.core_type<tc>} {
    %c0 = arith.constant 0 : index
    %c0_0 = arith.constant 0 : index
    %0 = vector.load %arg0[%c0, %c0_0] : memref<8x32xf32, #tpu.memory_space<vmem>>, vector<8x32xf32>
    %c0_1 = arith.constant 0 : index
    %c0_2 = arith.constant 0 : index
    %1 = vector.load %arg1[%c0_1, %c0_2] : memref<8x32xf32, #tpu.memory_space<vmem>>, vector<8x32xf32>
    %2 = arith.mulf %0, %0 : vector<8x32xf32>
    %cst = arith.constant dense<0.000000e+00> : vector<8xf32>
    %3 = vector.multi_reduction <add>, %2, %cst [1] : vector<8x32xf32> to vector<8xf32>
    %4 = vector.shape_cast %3 : vector<8xf32> to vector<8x1xf32>
    %cst_3 = arith.constant 9.99999996E-13 : f32
    %5 = vector.broadcast %cst_3 : f32 to vector<8x1xf32>
    %6 = arith.addf %4, %5 : vector<8x1xf32>
    %7 = math.rsqrt %6 : vector<8x1xf32>
    %8 = vector.broadcast %7 : vector<8x1xf32> to vector<8x32xf32>
    %9 = arith.mulf %0, %8 : vector<8x32xf32>
    %10 = arith.mulf %1, %1 : vector<8x32xf32>
    %cst_4 = arith.constant dense<0.000000e+00> : vector<8xf32>
    %11 = vector.multi_reduction <add>, %10, %cst_4 [1] : vector<8x32xf32> to vector<8xf32>
    %12 = vector.shape_cast %11 : vector<8xf32> to vector<8x1xf32>
    %cst_5 = arith.constant 9.99999996E-13 : f32
    %13 = vector.broadcast %cst_5 : f32 to vector<8x1xf32>
    %14 = arith.addf %12, %13 : vector<8x1xf32>
    %15 = math.rsqrt %14 : vector<8x1xf32>
    %16 = vector.broadcast %15 : vector<8x1xf32> to vector<8x32xf32>
    %17 = arith.mulf %1, %16 : vector<8x32xf32>
    %c0_6 = arith.constant 0 : index
    %c0_7 = arith.constant 0 : index
    %18 = vector.load %arg13[%c0_6, %c0_7] : memref<16x32xf32, #tpu.memory_space<vmem>>, vector<8x32xf32>
    tpu.vector_store %arg13[%c0_6, %c0_7], %9 {strides = array<i32>} : memref<16x32xf32, #tpu.memory_space<vmem>>, vector<8x32xf32>,
    %c8 = arith.constant 8 : index
    %c0_8 = arith.constant 0 : index
    %19 = vector.load %arg13[%c8, %c0_8] : memref<16x32xf32, #tpu.memory_space<vmem>>, vector<8x32xf32>
    tpu.vector_store %arg13[%c8, %c0_8], %17 {strides = array<i32>} : memref<16x32xf32, #tpu.memory_space<vmem>>, vector<8x32xf32>,
    %c0_9 = arith.constant 0 : index
    %c0_10 = arith.constant 0 : index
    %20 = vector.load %arg13[%c0_9, %c0_10] : memref<16x32xf32, #tpu.memory_space<vmem>>, vector<16x32xf32>
    %cst_11 = arith.constant 2.000000e+01 : f32
    %21 = vector.broadcast %cst_11 : f32 to vector<16x32xf32>
    %22 = arith.mulf %20, %21 : vector<16x32xf32>
    %23 = arith.truncf %22 : vector<16x32xf32> to vector<16x32xbf16>
    %24 = arith.truncf %20 : vector<16x32xf32> to vector<16x32xbf16>
    %cst_12 = arith.constant dense<0.000000e+00> : vector<16x16xf32>
    %25 = tpu.matmul %23, %24, %cst_12 {dimension_numbers = #tpu.dot_dimension_numbers<[1], [1], [0], [0], [0, 0, 1, 0], [], []>} : vector<16x32xbf16>, vector<16x32xbf16>, vector<16x16xf32> -> vector<16x16xf32>
    %26 = tpu.iota {dimensions = array<i32: 0>} : vector<16x16xi32>
    %27 = tpu.iota {dimensions = array<i32: 1>} : vector<16x16xi32>
    %28 = arith.cmpi eq, %26, %27 : vector<16x16xi32>
    %cst_13 = arith.constant -1.000000e+09 : f32
    %29 = vector.broadcast %cst_13 : f32 to vector<16x16xf32>
    %30 = arith.select %28, %29, %25 : vector<16x16xi1>, vector<16x16xf32>
    %cst_14 = arith.constant dense<0xFF800000> : vector<16xf32>
    %31 = vector.multi_reduction <maximumf>, %30, %cst_14 [1] : vector<16x16xf32> to vector<16xf32>
    %32 = vector.shape_cast %31 : vector<16xf32> to vector<16x1xf32>
    %33 = vector.broadcast %32 : vector<16x1xf32> to vector<16x16xf32>
    %34 = arith.subf %30, %33 : vector<16x16xf32>
    %35 = math.exp %34 : vector<16x16xf32>
    %cst_15 = arith.constant dense<0.000000e+00> : vector<16xf32>
    %36 = vector.multi_reduction <add>, %35, %cst_15 [1] : vector<16x16xf32> to vector<16xf32>
    %37 = vector.shape_cast %36 : vector<16xf32> to vector<16x1xf32>
    %38 = math.log %37 : vector<16x1xf32>
    %39 = arith.addf %38, %32 : vector<16x1xf32>
    %40 = arith.mulf %9, %17 : vector<8x32xf32>
    %cst_16 = arith.constant dense<0.000000e+00> : vector<8xf32>
    %41 = vector.multi_reduction <add>, %40, %cst_16 [1] : vector<8x32xf32> to vector<8xf32>
    %42 = vector.shape_cast %41 : vector<8xf32> to vector<8x1xf32>
    %cst_17 = arith.constant 2.000000e+01 : f32
    %43 = vector.broadcast %cst_17 : f32 to vector<8x1xf32>
    %44 = arith.mulf %42, %43 : vector<8x1xf32>
    %cst_18 = arith.constant dense<0.000000e+00> : vector<1xf32>
    %45 = vector.multi_reduction <add>, %39, %cst_18 [0] : vector<16x1xf32> to vector<1xf32>
    %46 = vector.shape_cast %45 : vector<1xf32> to vector<1x1xf32>
    %cst_19 = arith.constant dense<0.000000e+00> : vector<1xf32>
    %47 = vector.multi_reduction <add>, %44, %cst_19 [0] : vector<8x1xf32> to vector<1xf32>
    %48 = vector.shape_cast %47 : vector<1xf32> to vector<1x1xf32>
    %cst_20 = arith.constant 2.000000e+00 : f32
    %49 = vector.broadcast %cst_20 : f32 to vector<1x1xf32>
    %50 = arith.mulf %49, %48 : vector<1x1xf32>
    %51 = arith.subf %46, %50 : vector<1x1xf32>
    %cst_21 = arith.constant 6.250000e-02 : f32
    %52 = vector.broadcast %cst_21 : f32 to vector<1x1xf32>
    %53 = arith.mulf %51, %52 : vector<1x1xf32>
    %c0_22 = arith.constant 0 : index
    %c0_23 = arith.constant 0 : index
    %54 = vector.load %arg4[%c0_22, %c0_23] : memref<32x32xf32, #tpu.memory_space<vmem>>, vector<32x32xf32>
    %c0_24 = arith.constant 0 : index
    %c0_25 = arith.constant 0 : index
    %55 = vector.load %arg5[%c0_24, %c0_25] : memref<1x32xf32, #tpu.memory_space<vmem>>, vector<1x32xf32>
    %c0_26 = arith.constant 0 : index
    %c0_27 = arith.constant 0 : index
    %56 = vector.load %arg6[%c0_26, %c0_27] : memref<1x32xf32, #tpu.memory_space<vmem>>, vector<1x32xf32>
    %c0_28 = arith.constant 0 : index
    %c0_29 = arith.constant 0 : index
    %57 = vector.load %arg7[%c0_28, %c0_29] : memref<1x32xf32, #tpu.memory_space<vmem>>, vector<1x32xf32>
    %c0_30 = arith.constant 0 : index
    %c0_31 = arith.constant 0 : index
    %58 = vector.load %arg8[%c0_30, %c0_31] : memref<32x16xf32, #tpu.memory_space<vmem>>, vector<32x16xf32>
    %c0_32 = arith.constant 0 : index
    %c0_33 = arith.constant 0 : index
    %59 = vector.load %arg9[%c0_32, %c0_33] : memref<1x16xf32, #tpu.memory_space<vmem>>, vector<1x16xf32>
    %c0_34 = arith.constant 0 : index
    %c0_35 = arith.constant 0 : index
    %60 = vector.load %arg10[%c0_34, %c0_35] : memref<1x16xf32, #tpu.memory_space<vmem>>, vector<1x16xf32>
    %c0_36 = arith.constant 0 : index
    %c0_37 = arith.constant 0 : index
    %61 = vector.load %arg11[%c0_36, %c0_37] : memref<1x16xf32, #tpu.memory_space<vmem>>, vector<1x16xf32>
    %c0_38 = arith.constant 0 : index
    %c0_39 = arith.constant 0 : index
    %62 = vector.load %arg2[%c0_38, %c0_39] : memref<8x32xf32, #tpu.memory_space<vmem>>, vector<8x32xf32>
    %cst_40 = arith.constant dense<0.000000e+00> : vector<8x32xf32>
    %63 = tpu.matmul %62, %54, %cst_40 {dimension_numbers = #tpu.dot_dimension_numbers<[1], [0], [0], [1], [0, 0, 1, 1], [], []>} : vector<8x32xf32>, vector<32x32xf32>, vector<8x32xf32> -> vector<8x32xf32>
    %64 = vector.broadcast %55 : vector<1x32xf32> to vector<8x32xf32>
    %65 = arith.addf %63, %64 : vector<8x32xf32>
    %cst_41 = arith.constant dense<0.000000e+00> : vector<32xf32>
    %66 = vector.multi_reduction <add>, %65, %cst_41 [0] : vector<8x32xf32> to vector<32xf32>
    %67 = vector.shape_cast %66 : vector<32xf32> to vector<1x32xf32>
    %cst_42 = arith.constant 8.000000e+00 : f32
    %68 = vector.broadcast %cst_42 : f32 to vector<1x32xf32>
    %69 = arith.divf %67, %68 : vector<1x32xf32>
    %70 = vector.broadcast %69 : vector<1x32xf32> to vector<8x32xf32>
    %71 = arith.subf %65, %70 : vector<8x32xf32>
    %72 = vector.broadcast %69 : vector<1x32xf32> to vector<8x32xf32>
    %73 = arith.subf %65, %72 : vector<8x32xf32>
    %74 = arith.mulf %71, %73 : vector<8x32xf32>
    %cst_43 = arith.constant dense<0.000000e+00> : vector<32xf32>
    %75 = vector.multi_reduction <add>, %74, %cst_43 [0] : vector<8x32xf32> to vector<32xf32>
    %76 = vector.shape_cast %75 : vector<32xf32> to vector<1x32xf32>
    %cst_44 = arith.constant 8.000000e+00 : f32
    %77 = vector.broadcast %cst_44 : f32 to vector<1x32xf32>
    %78 = arith.divf %76, %77 : vector<1x32xf32>
    %79 = vector.broadcast %69 : vector<1x32xf32> to vector<8x32xf32>
    %80 = arith.subf %65, %79 : vector<8x32xf32>
    %cst_45 = arith.constant 9.99999974E-6 : f32
    %81 = vector.broadcast %cst_45 : f32 to vector<1x32xf32>
    %82 = arith.addf %78, %81 : vector<1x32xf32>
    %83 = math.rsqrt %82 : vector<1x32xf32>
    %84 = vector.broadcast %83 : vector<1x32xf32> to vector<8x32xf32>
    %85 = arith.mulf %80, %84 : vector<8x32xf32>
    %86 = vector.broadcast %56 : vector<1x32xf32> to vector<8x32xf32>
    %87 = arith.mulf %85, %86 : vector<8x32xf32>
    %88 = vector.broadcast %57 : vector<1x32xf32> to vector<8x32xf32>
    %89 = arith.addf %87, %88 : vector<8x32xf32>
    %cst_46 = arith.constant 0.000000e+00 : f32
    %90 = vector.broadcast %cst_46 : f32 to vector<8x32xf32>
    %91 = arith.maximumf %89, %90 : vector<8x32xf32>
    %cst_47 = arith.constant dense<0.000000e+00> : vector<8x16xf32>
    %92 = tpu.matmul %91, %58, %cst_47 {dimension_numbers = #tpu.dot_dimension_numbers<[1], [0], [0], [1], [0, 0, 1, 1], [], []>} : vector<8x32xf32>, vector<32x16xf32>, vector<8x16xf32> -> vector<8x16xf32>
    %93 = vector.broadcast %59 : vector<1x16xf32> to vector<8x16xf32>
    %94 = arith.addf %92, %93 : vector<8x16xf32>
    %cst_48 = arith.constant dense<0.000000e+00> : vector<16xf32>
    %95 = vector.multi_reduction <add>, %94, %cst_48 [0] : vector<8x16xf32> to vector<16xf32>
    %96 = vector.shape_cast %95 : vector<16xf32> to vector<1x16xf32>
    %cst_49 = arith.constant 8.000000e+00 : f32
    %97 = vector.broadcast %cst_49 : f32 to vector<1x16xf32>
    %98 = arith.divf %96, %97 : vector<1x16xf32>
    %99 = vector.broadcast %98 : vector<1x16xf32> to vector<8x16xf32>
    %100 = arith.subf %94, %99 : vector<8x16xf32>
    %101 = vector.broadcast %98 : vector<1x16xf32> to vector<8x16xf32>
    %102 = arith.subf %94, %101 : vector<8x16xf32>
    %103 = arith.mulf %100, %102 : vector<8x16xf32>
    %cst_50 = arith.constant dense<0.000000e+00> : vector<16xf32>
    %104 = vector.multi_reduction <add>, %103, %cst_50 [0] : vector<8x16xf32> to vector<16xf32>
    %105 = vector.shape_cast %104 : vector<16xf32> to vector<1x16xf32>
    %cst_51 = arith.constant 8.000000e+00 : f32
    %106 = vector.broadcast %cst_51 : f32 to vector<1x16xf32>
    %107 = arith.divf %105, %106 : vector<1x16xf32>
    %108 = vector.broadcast %98 : vector<1x16xf32> to vector<8x16xf32>
    %109 = arith.subf %94, %108 : vector<8x16xf32>
    %cst_52 = arith.constant 9.99999974E-6 : f32
    %110 = vector.broadcast %cst_52 : f32 to vector<1x16xf32>
    %111 = arith.addf %107, %110 : vector<1x16xf32>
    %112 = math.rsqrt %111 : vector<1x16xf32>
    %113 = vector.broadcast %112 : vector<1x16xf32> to vector<8x16xf32>
    %114 = arith.mulf %109, %113 : vector<8x16xf32>
    %115 = vector.broadcast %60 : vector<1x16xf32> to vector<8x16xf32>
    %116 = arith.mulf %114, %115 : vector<8x16xf32>
    %117 = vector.broadcast %61 : vector<1x16xf32> to vector<8x16xf32>
    %118 = arith.addf %116, %117 : vector<8x16xf32>
    %cst_53 = arith.constant dense<0xFF800000> : vector<8xf32>
    %119 = vector.multi_reduction <maximumf>, %118, %cst_53 [1] : vector<8x16xf32> to vector<8xf32>
    %120 = vector.shape_cast %119 : vector<8xf32> to vector<8x1xf32>
    %121 = vector.broadcast %120 : vector<8x1xf32> to vector<8x16xf32>
    %122 = arith.subf %118, %121 : vector<8x16xf32>
    %123 = math.exp %122 : vector<8x16xf32>
    %cst_54 = arith.constant dense<0.000000e+00> : vector<8xf32>
    %124 = vector.multi_reduction <add>, %123, %cst_54 [1] : vector<8x16xf32> to vector<8xf32>
    %125 = vector.shape_cast %124 : vector<8xf32> to vector<8x1xf32>
    %126 = tpu.reciprocal %125 {approx = true} : vector<8x1xf32> -> vector<8x1xf32>
    %127 = vector.broadcast %126 : vector<8x1xf32> to vector<8x16xf32>
    %128 = arith.mulf %123, %127 : vector<8x16xf32>
    %c0_55 = arith.constant 0 : index
    %c0_56 = arith.constant 0 : index
    %129 = vector.load %arg3[%c0_55, %c0_56] : memref<8x32xf32, #tpu.memory_space<vmem>>, vector<8x32xf32>
    %cst_57 = arith.constant dense<0.000000e+00> : vector<8x32xf32>
    %130 = tpu.matmul %129, %54, %cst_57 {dimension_numbers = #tpu.dot_dimension_numbers<[1], [0], [0], [1], [0, 0, 1, 1], [], []>} : vector<8x32xf32>, vector<32x32xf32>, vector<8x32xf32> -> vector<8x32xf32>
    %131 = vector.broadcast %55 : vector<1x32xf32> to vector<8x32xf32>
    %132 = arith.addf %130, %131 : vector<8x32xf32>
    %cst_58 = arith.constant dense<0.000000e+00> : vector<32xf32>
    %133 = vector.multi_reduction <add>, %132, %cst_58 [0] : vector<8x32xf32> to vector<32xf32>
    %134 = vector.shape_cast %133 : vector<32xf32> to vector<1x32xf32>
    %cst_59 = arith.constant 8.000000e+00 : f32
    %135 = vector.broadcast %cst_59 : f32 to vector<1x32xf32>
    %136 = arith.divf %134, %135 : vector<1x32xf32>
    %137 = vector.broadcast %136 : vector<1x32xf32> to vector<8x32xf32>
    %138 = arith.subf %132, %137 : vector<8x32xf32>
    %139 = vector.broadcast %136 : vector<1x32xf32> to vector<8x32xf32>
    %140 = arith.subf %132, %139 : vector<8x32xf32>
    %141 = arith.mulf %138, %140 : vector<8x32xf32>
    %cst_60 = arith.constant dense<0.000000e+00> : vector<32xf32>
    %142 = vector.multi_reduction <add>, %141, %cst_60 [0] : vector<8x32xf32> to vector<32xf32>
    %143 = vector.shape_cast %142 : vector<32xf32> to vector<1x32xf32>
    %cst_61 = arith.constant 8.000000e+00 : f32
    %144 = vector.broadcast %cst_61 : f32 to vector<1x32xf32>
    %145 = arith.divf %143, %144 : vector<1x32xf32>
    %146 = vector.broadcast %136 : vector<1x32xf32> to vector<8x32xf32>
    %147 = arith.subf %132, %146 : vector<8x32xf32>
    %cst_62 = arith.constant 9.99999974E-6 : f32
    %148 = vector.broadcast %cst_62 : f32 to vector<1x32xf32>
    %149 = arith.addf %145, %148 : vector<1x32xf32>
    %150 = math.rsqrt %149 : vector<1x32xf32>
    %151 = vector.broadcast %150 : vector<1x32xf32> to vector<8x32xf32>
    %152 = arith.mulf %147, %151 : vector<8x32xf32>
    %153 = vector.broadcast %56 : vector<1x32xf32> to vector<8x32xf32>
    %154 = arith.mulf %152, %153 : vector<8x32xf32>
    %155 = vector.broadcast %57 : vector<1x32xf32> to vector<8x32xf32>
    %156 = arith.addf %154, %155 : vector<8x32xf32>
    %cst_63 = arith.constant 0.000000e+00 : f32
    %157 = vector.broadcast %cst_63 : f32 to vector<8x32xf32>
    %158 = arith.maximumf %156, %157 : vector<8x32xf32>
    %cst_64 = arith.constant dense<0.000000e+00> : vector<8x16xf32>
    %159 = tpu.matmul %158, %58, %cst_64 {dimension_numbers = #tpu.dot_dimension_numbers<[1], [0], [0], [1], [0, 0, 1, 1], [], []>} : vector<8x32xf32>, vector<32x16xf32>, vector<8x16xf32> -> vector<8x16xf32>
    %160 = vector.broadcast %59 : vector<1x16xf32> to vector<8x16xf32>
    %161 = arith.addf %159, %160 : vector<8x16xf32>
    %cst_65 = arith.constant dense<0.000000e+00> : vector<16xf32>
    %162 = vector.multi_reduction <add>, %161, %cst_65 [0] : vector<8x16xf32> to vector<16xf32>
    %163 = vector.shape_cast %162 : vector<16xf32> to vector<1x16xf32>
    %cst_66 = arith.constant 8.000000e+00 : f32
    %164 = vector.broadcast %cst_66 : f32 to vector<1x16xf32>
    %165 = arith.divf %163, %164 : vector<1x16xf32>
    %166 = vector.broadcast %165 : vector<1x16xf32> to vector<8x16xf32>
    %167 = arith.subf %161, %166 : vector<8x16xf32>
    %168 = vector.broadcast %165 : vector<1x16xf32> to vector<8x16xf32>
    %169 = arith.subf %161, %168 : vector<8x16xf32>
    %170 = arith.mulf %167, %169 : vector<8x16xf32>
    %cst_67 = arith.constant dense<0.000000e+00> : vector<16xf32>
    %171 = vector.multi_reduction <add>, %170, %cst_67 [0] : vector<8x16xf32> to vector<16xf32>
    %172 = vector.shape_cast %171 : vector<16xf32> to vector<1x16xf32>
    %cst_68 = arith.constant 8.000000e+00 : f32
    %173 = vector.broadcast %cst_68 : f32 to vector<1x16xf32>
    %174 = arith.divf %172, %173 : vector<1x16xf32>
    %175 = vector.broadcast %165 : vector<1x16xf32> to vector<8x16xf32>
    %176 = arith.subf %161, %175 : vector<8x16xf32>
    %cst_69 = arith.constant 9.99999974E-6 : f32
    %177 = vector.broadcast %cst_69 : f32 to vector<1x16xf32>
    %178 = arith.addf %174, %177 : vector<1x16xf32>
    %179 = math.rsqrt %178 : vector<1x16xf32>
    %180 = vector.broadcast %179 : vector<1x16xf32> to vector<8x16xf32>
    %181 = arith.mulf %176, %180 : vector<8x16xf32>
    %182 = vector.broadcast %60 : vector<1x16xf32> to vector<8x16xf32>
    %183 = arith.mulf %181, %182 : vector<8x16xf32>
    %184 = vector.broadcast %61 : vector<1x16xf32> to vector<8x16xf32>
    %185 = arith.addf %183, %184 : vector<8x16xf32>
    %cst_70 = arith.constant dense<0xFF800000> : vector<8xf32>
    %186 = vector.multi_reduction <maximumf>, %185, %cst_70 [1] : vector<8x16xf32> to vector<8xf32>
    %187 = vector.shape_cast %186 : vector<8xf32> to vector<8x1xf32>
    %188 = vector.broadcast %187 : vector<8x1xf32> to vector<8x16xf32>
    %189 = arith.subf %185, %188 : vector<8x16xf32>
    %190 = math.exp %189 : vector<8x16xf32>
    %cst_71 = arith.constant dense<0.000000e+00> : vector<8xf32>
    %191 = vector.multi_reduction <add>, %190, %cst_71 [1] : vector<8x16xf32> to vector<8xf32>
    %192 = vector.shape_cast %191 : vector<8xf32> to vector<8x1xf32>
    %193 = tpu.reciprocal %192 {approx = true} : vector<8x1xf32> -> vector<8x1xf32>
    %194 = vector.broadcast %193 : vector<8x1xf32> to vector<8x16xf32>
    %195 = arith.mulf %190, %194 : vector<8x16xf32>
    %196 = tpu.reciprocal %128 {approx = true} : vector<8x16xf32> -> vector<8x16xf32>
    %197 = tpu.reciprocal %195 {approx = true} : vector<8x16xf32> -> vector<8x16xf32>
    %cst_72 = arith.constant dense<0.000000e+00> : vector<8x8xf32>
    %198 = tpu.matmul %128, %197, %cst_72 {dimension_numbers = #tpu.dot_dimension_numbers<[1], [1], [0], [0], [0, 0, 1, 0], [], []>} : vector<8x16xf32>, vector<8x16xf32>, vector<8x8xf32> -> vector<8x8xf32>
    %cst_73 = arith.constant dense<0.000000e+00> : vector<8x8xf32>
    %199 = tpu.matmul %195, %196, %cst_73 {dimension_numbers = #tpu.dot_dimension_numbers<[1], [1], [0], [0], [0, 0, 1, 0], [], []>} : vector<8x16xf32>, vector<8x16xf32>, vector<8x8xf32> -> vector<8x8xf32>
    %200 = arith.mulf %198, %199 : vector<8x8xf32>
    %201 = math.log %200 : vector<8x8xf32>
    %cst_74 = arith.constant 1.000000e+00 : f32
    %202 = vector.broadcast %cst_74 : f32 to vector<8x8xf32>
    %203 = arith.mulf %201, %202 : vector<8x8xf32>
    %cst_75 = arith.constant 1.000000e+00 : f32
    %204 = vector.broadcast %cst_75 : f32 to vector<8x8xf32>
    %205 = arith.addf %203, %204 : vector<8x8xf32>
    %206 = tpu.reciprocal %205 {approx = true} : vector<8x8xf32> -> vector<8x8xf32>
    %cst_76 = arith.constant dense<0xFF800000> : vector<8xf32>
    %207 = vector.multi_reduction <maximumf>, %206, %cst_76 [1] : vector<8x8xf32> to vector<8xf32>
    %208 = vector.shape_cast %207 : vector<8xf32> to vector<8x1xf32>
    %209 = vector.broadcast %208 : vector<8x1xf32> to vector<8x8xf32>
    %210 = arith.subf %206, %209 : vector<8x8xf32>
    %211 = math.exp %210 : vector<8x8xf32>
    %cst_77 = arith.constant dense<0.000000e+00> : vector<8xf32>
    %212 = vector.multi_reduction <add>, %211, %cst_77 [1] : vector<8x8xf32> to vector<8xf32>
    %213 = vector.shape_cast %212 : vector<8xf32> to vector<8x1xf32>
    %214 = math.log %213 : vector<8x1xf32>
    %215 = arith.addf %214, %208 : vector<8x1xf32>
    %216 = arith.mulf %128, %197 : vector<8x16xf32>
    %cst_78 = arith.constant dense<0.000000e+00> : vector<8xf32>
    %217 = vector.multi_reduction <add>, %216, %cst_78 [1] : vector<8x16xf32> to vector<8xf32>
    %218 = vector.shape_cast %217 : vector<8xf32> to vector<8x1xf32>
    %219 = arith.mulf %195, %196 : vector<8x16xf32>
    %cst_79 = arith.constant dense<0.000000e+00> : vector<8xf32>
    %220 = vector.multi_reduction <add>, %219, %cst_79 [1] : vector<8x16xf32> to vector<8xf32>
    %221 = vector.shape_cast %220 : vector<8xf32> to vector<8x1xf32>
    %222 = arith.mulf %218, %221 : vector<8x1xf32>
    %223 = math.log %222 : vector<8x1xf32>
    %cst_80 = arith.constant 1.000000e+00 : f32
    %224 = vector.broadcast %cst_80 : f32 to vector<8x1xf32>
    %225 = arith.mulf %223, %224 : vector<8x1xf32>
    %cst_81 = arith.constant 1.000000e+00 : f32
    %226 = vector.broadcast %cst_81 : f32 to vector<8x1xf32>
    %227 = arith.addf %225, %226 : vector<8x1xf32>
    %228 = tpu.reciprocal %227 {approx = true} : vector<8x1xf32> -> vector<8x1xf32>
    %cst_82 = arith.constant dense<0.000000e+00> : vector<1xf32>
    %229 = vector.multi_reduction <add>, %215, %cst_82 [0] : vector<8x1xf32> to vector<1xf32>
    %230 = vector.shape_cast %229 : vector<1xf32> to vector<1x1xf32>
    %cst_83 = arith.constant dense<0.000000e+00> : vector<1xf32>
    %231 = vector.multi_reduction <add>, %228, %cst_83 [0] : vector<8x1xf32> to vector<1xf32>
    %232 = vector.shape_cast %231 : vector<1xf32> to vector<1x1xf32>
    %233 = arith.subf %230, %232 : vector<1x1xf32>
    %cst_84 = arith.constant 1.250000e-01 : f32
    %234 = vector.broadcast %cst_84 : f32 to vector<1x1xf32>
    %235 = arith.mulf %233, %234 : vector<1x1xf32>
    %cst_85 = arith.constant 5.000000e-01 : f32
    %236 = vector.broadcast %cst_85 : f32 to vector<1x1xf32>
    %237 = arith.mulf %236, %53 : vector<1x1xf32>
    %238 = arith.addf %237, %235 : vector<1x1xf32>
    %c0_86 = arith.constant 0 : index
    %c0_87 = arith.constant 0 : index
    %239 = vector.load %arg12[%c0_86, %c0_87] : memref<1x1xf32, #tpu.memory_space<vmem>>, vector<1x1xf32>
    tpu.vector_store %arg12[%c0_86, %c0_87], %238 {strides = array<i32>} : memref<1x1xf32, #tpu.memory_space<vmem>>, vector<1x1xf32>,
    return
  }
}

</mosaic_0001>

<bundles_post_ra>
// kernel: tpu_custom_call.1
= control target key start
LH: loop header
LB: loop body
LE: loop exit
PB: predicated region body
PF: predicated region fallthrough
CT: control target
= control target key end

     0   :  { %17 = vsyncpa [#allocation4], 0  ;;  %s1314_s0 = inlined_call_operand.vmem [shape: f32[8,32], index: 0, kind: input, shape index: {}]   ;;  %s1315_s1 = inlined_call_operand.vmem [shape: f32[8,32], index: 1, kind: input, shape index: {}]   ;;  %s1316_s2 = inlined_call_operand.hbm [shape: f32[8,32], index: 2, kind: input, shape index: {}]   ;;  %s1317_s3 = inlined_call_operand.hbm [shape: f32[8,32], index: 3, kind: input, shape index: {}]   ;;  %s1318_s4 = inlined_call_operand.vmem [shape: f32[32,32], index: 4, kind: input, shape index: {}]   ;;  %s1319_s5 = inlined_call_operand.vmem [shape: f32[1,32], index: 5, kind: input, shape index: {}]   ;;  %s1320_s6 = inlined_call_operand.vmem [shape: f32[1,32], index: 6, kind: input, shape index: {}]   ;;  %s1321_s7 = inlined_call_operand.vmem [shape: f32[1,32], index: 7, kind: input, shape index: {}]   ;;  %s1322_s8 = inlined_call_operand.vmem [shape: f32[32,16], index: 8, kind: input, shape index: {}]   ;;  %s1323_s9 = inlined_call_operand.vmem [shape: f32[1,16], index: 9, kind: input, shape index: {}]   ;;  %s1324_s10 = inlined_call_operand.vmem [shape: f32[1,16], index: 10, kind: input, shape index: {}]   ;;  %s1325_s11 = inlined_call_operand.vmem [shape: f32[1,16], index: 11, kind: input, shape index: {}]   ;;  %s1326_s12 = inlined_call_operand.hbm [shape: f32[1,1], index: 12, kind: output, shape index: {}]  }
   0x1   :  { %18 = vsyncpa [#allocation7], 0 }
   0x2   :  { %19 = vsyncpa [#allocation5], 0  ;;  %s1090_s21 = smov [#allocation3]   ;;  %s1091_s23 = smov [#allocation6]  }
   0x3   :  { %s30_s22 = sshll.u32 %s1090_s21, 4  ;;  %s40_s24 = sshll.u32 %s1091_s23, 4  ;;  %s31_s22 = int_to_ptr.vmem [resolvable:$true] %s30_s22  ;;  %s41_s24 = int_to_ptr.vmem [resolvable:$true] %s40_s24 }
   0x4   :  { %s1032_s25 = scalar_lea.vmem %s31_s22, 128  ;;  %p1037_p1 = scmp.lt.s32.totalorder %s31_s22, %s31_s22 }
   0x5   :  { %p1033_p0 = scmp.ne.s32.totalorder %s31_s22, %s1032_s25  ;;  %p1038_p2 = scmp.lt.s32.totalorder %s1032_s25, %s1032_s25 }
   0x7   :  { %p1039_p3 = por %p1038_p2, %p1037_p1 }
   0x9   :  { %p1040_p4 = pnand %p1039_p3, %p1033_p0 }
   0xb   :  { %1043 = shalt.err (!%p1040_p4)
}
   0xc   :  { %33 = dma.hbm_to_vmem [thread:$0]  %s1316_s2, 128, %s31_s22, [#allocation4]  }
   0xd   :  { %s1052_s28 = scalar_lea.vmem %s41_s24, 128  ;;  %p1057_p6 = scmp.lt.s32.totalorder %s41_s24, %s41_s24 }
   0xe   :  { %p1053_p5 = scmp.ne.s32.totalorder %s41_s24, %s1052_s28  ;;  %p1058_p7 = scmp.lt.s32.totalorder %s1052_s28, %s1052_s28 }
  0x10   :  { %p1059_p8 = por %p1058_p7, %p1057_p6 }
  0x12   :  { %p1060_p9 = pnand %p1059_p8, %p1053_p5 }
  0x14   :  { %1063 = shalt.err (!%p1060_p9)
}
  0x15   :  { %43 = dma.hbm_to_vmem [thread:$0]  %s1317_s3, 128, %s41_s24, [#allocation7]  }
  0x16   :  { %1084 = dma.done.wait [#allocation4], 128  }
  0x17   :  { %1085 = vsyncadd [#allocation4], 4294967168 }
  0x18   :  { %1086 = dma.done.wait [#allocation7], 128  }
  0x19   :  { %1087 = vsyncadd [#allocation7], 4294967168  ;;  %v1092_v0 = vmov 0.0   ;;  %vm1093_vm0 = vmmov 0   ;;  %v197_v1 = vld [vmem:[%s1318_s4 + $0x18] sm:$0xff]  ;;  %v196_v2 = vld [vmem:[%s1318_s4 + $0x10] sm:$0xff] }
  0x1a   :  { %921 = vmatprep.subr.mxu1 %v1092_v0  ;;  %929 = vmatprep.mubr.msk.f32.mxu1 %vm1093_vm0, %v1092_v0  ;;  %v195_v3 = vld [vmem:[%s1318_s4 + $0x8] sm:$0xff]  ;;  %v67_v4 = vld [vmem:[%s1314_s0] sm:$0xff]  ;;  %vm70_vm1 = vcmask 261120   ;;  %v208_v9 = vld [vmem:[#allocation3] sm:$0xff]  ;;  %vm148_vm2 = vcmask 130048   ;;  %vm814_vm5 = vcmask 64512  }
  0x1b   :  { %915 = vmatprep.subr.bf16.mxu0 %v1092_v0  ;;  %917 = vmatprep.mubr.msk.bf16.mxu0 %vm1093_vm0, %v1092_v0  ;;  %v68_v5 = vld [vmem:[%s1315_s1] sm:$0xff]  ;;  %v69_v6 = vmul.f32 %v67_v4, %v67_v4  ;;  %v450_v12 = vld [vmem:[#allocation6] sm:$0xff]  ;;  %v1221_v30 = vld [vmem:[%s1322_s8 + $0x10] sm:$0xff]  ;;  %vm856_vm6 = vcmask 0  }
  0x1c   :  { %922 = vmatpush3.msra.mxu1 %v197_v1  ;;  %v77_v7 = vmul.f32 %v68_v5, %v68_v5  ;;  %v194_v8 = vld [vmem:[%s1318_s4] sm:$0xff]  ;;  %v1215_v29 = vld [vmem:[%s1322_s8 + $0x18] sm:$0xff]  ;;  %v1230_v31 = vld [vmem:[%s1322_s8 + $0x8] sm:$0xff] }
  0x1d   :  { %923 = vmatprep.subr.mxu1 %v1092_v0  ;;  %v71_v10 = vsel %vm70_vm1, %v69_v6, 0.0  ;;  %v1237_v32 = vld [vmem:[%s1322_s8] sm:$0xff] }
  0x1e   :  { %924 = vmatpush3.msra.mxu1 %v196_v2  ;;  %72 = vadd.xlane.f32.xlu0 %v71_v10  ;;  %v78_v11 = vsel %vm70_vm1, %v77_v7, 0.0  ;;  %v875_v33 = vld [vmem:[%s1319_s5] ss:$0 sm:$0xff] }
  0x1f   :  { %925 = vmatprep.subr.mxu1 %v1092_v0 }
  0x20   :  { %926 = vmatpush3.msra.mxu1 %v195_v3 }
  0x21   :  { %927 = vmatprep.subr.mxu1 %v1092_v0 }
  0x22   :  { %928 = vmatpush3.msra.mxu1 %v194_v8  ;;  %79 = vadd.xlane.f32.xlu0 %v78_v11 }
  0x23   :  { %930 = vmatmul.mubr.msk.f32.vlgmr.msra.gmra.mxu1 %vm70_vm1, %v208_v9  ;;  %943 = vmatprep.subr.mxu1 %v1092_v0 }
  0x24   :  { %944 = vmatpush3.msra.mxu1 %v197_v1  ;;  %951 = vmatprep.mubr.msk.f32.mxu1 %vm1093_vm0, %v1092_v0 }
  0x25   :  { %945 = vmatprep.subr.mxu1 %v1092_v0 }
  0x26   :  { %946 = vmatpush3.msra.mxu1 %v196_v2 }
  0x27   :  { %947 = vmatprep.subr.mxu1 %v1092_v0 }
  0x28   :  { %948 = vmatpush3.msra.mxu1 %v195_v3 }
  0x29   :  { %949 = vmatprep.subr.mxu1 %v1092_v0 }
  0x2a   :  { %950 = vmatpush3.msra.mxu1 %v194_v8 }
  0x2b   :  { %952 = vmatmul.mubr.msk.f32.vlgmr.msra.gmra.mxu1 %vm70_vm1, %v450_v12  ;;  %965 = vmatprep.subr.mxu1 %v1092_v0 }
  0x2c   :  { %967 = vmatprep.mubr.msk.f32.mxu1 %vm1093_vm0, %v1092_v0 }
  0xa7   :  { %v73_v13 = vpop.xlane.xlu0 %72 }
  0xa8   :  { %v74_v14 = vadd.f32 1e-12, %v73_v13 }
  0xaa   :  { %980 = vrsqrt.f32 %v74_v14 }
  0xab   :  { %v80_v15 = vpop.xlane.xlu0 %79 }
  0xac   :  { %v81_v16 = vadd.f32 1e-12, %v80_v15 }
  0xae   :  { %982 = vrsqrt.f32 %v81_v16  ;;  %v877_v16 = vld [vmem:[%s1320_s6] ss:$0 sm:$0xff] }
  0xb7   :  { %v981_v17 = vpop.eup %980 }
  0xb8   :  { %v76_v18 = vmul.f32 %v981_v17, %v67_v4 }
  0xba   :  { %84 = vst.msk [vmem:[#allocation2] sm:$0xff] %vm70_vm1, %v76_v18 }
  0xbb   :  { %v983_v19 = vpop.eup %982 }
  0xbc   :  { %v83_v20 = vmul.f32 %v983_v19, %v68_v5 }
  0xbe   :  { %85 = vst.msk [vmem:[#allocation2 + $0x8] sm:$0xff] %vm70_vm1, %v83_v20  ;;  %v1208_v21 = vmul.f32 %v83_v20, %v76_v18  ;;  %v878_v18 = vld [vmem:[%s1321_s7] ss:$0 sm:$0xff] }
  0xc1   :  { %v86_v22 = vld [vmem:[#allocation2] sm:$0xff] }
  0xc2   :  { %v88_v25 = vmul.f32 20.0, %v86_v22 }
  0xc5   :  { %v87_v23 = vld [vmem:[#allocation2 + $0x8] sm:$0xff] }
  0xc6   :  { %v91_v24 = vpack.c.bf16 %v87_v23, %v86_v22  ;;  %v89_v26 = vmul.f32 20.0, %v87_v23 }
  0xc8   :  { %v96_v27 = vsel %vm70_vm1, %v91_v24, 0  ;;  %v90_v28 = vpack.c.bf16 %v89_v26, %v88_v25 }
  0xc9   :  { %916 = vmatpush3.bf16.xpose.msra.mxu0 %v96_v27 }
  0xca   :  { %932 = vmatprep.subr.mxu0 %v1092_v0 }
  0xd0   :  { %918 = vmatmul.mubr.msk.bf16.vlgmr.msra.gmra.mxu0 %vm70_vm1, %v90_v28 }
  0xd1   :  { %933 = vmatpush3.msra.mxu0 %v1215_v29  ;;  %940 = vmatprep.mubr.msk.f32.mxu0 %vm1093_vm0, %v1092_v0 }
  0xd2   :  { %934 = vmatprep.subr.mxu0 %v1092_v0 }
  0xd3   :  { %935 = vmatpush3.msra.mxu0 %v1221_v30 }
  0xd4   :  { %936 = vmatprep.subr.mxu0 %v1092_v0 }
  0xd5   :  { %937 = vmatpush3.msra.mxu0 %v1230_v31 }
  0xd6   :  { %938 = vmatprep.subr.mxu0 %v1092_v0 }
  0xd7   :  { %939 = vmatpush3.msra.mxu0 %v1237_v32 }
  0xd8   :  { %954 = vmatprep.subr.mxu0 %v1092_v0 }
  0xe3   :  { %v284_v34 = vpop.f32.mrf.mxu1 }
  0xe4   :  { %v285_v35 = vadd.f32 %v875_v33, %v284_v34 }
  0xe5   :  { %v931_v36 = vpop.f32.mrf.mxu1 }
  0xe6   :  { %v288_v37 = vsel %vm70_vm1, %v285_v35, 0.0 }
  0xe7   :  { %v289_v38 = vrot.slane %v288_v37, 4 }
  0xe9   :  { %v290_v39 = vadd.f32 %v289_v38, %v288_v37 }
  0xeb   :  { %v291_v40 = vrot.slane %v290_v39, 2  ;;  %v520_v41 = vpop.f32.mrf.mxu1 }
  0xec   :  { %v521_v42 = vadd.f32 %v875_v33, %v520_v41 }
  0xed   :  { %v292_v43 = vadd.f32 %v291_v40, %v290_v39  ;;  %v953_v44 = vpop.f32.mrf.mxu1 }
  0xee   :  { %v524_v45 = vsel %vm70_vm1, %v521_v42, 0.0 }
  0xef   :  { %v293_v46 = vrot.slane %v292_v43, 1  ;;  %v525_v47 = vrot.slane %v524_v45, 4 }
  0xf1   :  { %v294_v48 = vadd.f32 %v293_v46, %v292_v43  ;;  %v526_v49 = vadd.f32 %v525_v47, %v524_v45 }
  0xf3   :  { %v296_v50 = vmul.f32 0.125, %v294_v48  ;;  %v527_v51 = vrot.slane %v526_v49, 2 }
  0xf5   :  { %v297_v52 = vsub.f32 %v285_v35, %v296_v50  ;;  %v528_v53 = vadd.f32 %v527_v51, %v526_v49 }
  0xf7   :  { %v298_v54 = vmul.f32 %v297_v52, %v297_v52  ;;  %v529_v55 = vrot.slane %v528_v53, 1 }
  0xf9   :  { %v299_v56 = vsel %vm70_vm1, %v298_v54, 0.0  ;;  %v530_v57 = vadd.f32 %v529_v55, %v528_v53 }
  0xfa   :  { %v300_v58 = vrot.slane %v299_v56, 4 }
  0xfb   :  { %v531_v59 = vmul.f32 0.125, %v530_v57 }
  0xfc   :  { %v301_v60 = vadd.f32 %v300_v58, %v299_v56 }
  0xfd   :  { %v532_v61 = vsub.f32 %v521_v42, %v531_v59 }
  0xfe   :  { %v302_v62 = vrot.slane %v301_v60, 2 }
  0xff   :  { %v533_v63 = vmul.f32 %v532_v61, %v532_v61 }
 0x100   :  { %v303_v1 = vadd.f32 %v302_v62, %v301_v60 }
 0x101   :  { %v534_v2 = vsel %vm70_vm1, %v533_v63, 0.0 }
 0x102   :  { %v304_v3 = vrot.slane %v303_v1, 1  ;;  %v535_v4 = vrot.slane %v534_v2, 4 }
 0x104   :  { %v305_v5 = vadd.f32 %v304_v3, %v303_v1  ;;  %v536_v6 = vadd.f32 %v535_v4, %v534_v2 }
 0x106   :  { %v306_v7 = vmul.f32 0.125, %v305_v5  ;;  %v537_v8 = vrot.slane %v536_v6, 2 }
 0x108   :  { %v307_v9 = vadd.f32 1e-05, %v306_v7  ;;  %v538_v10 = vadd.f32 %v537_v8, %v536_v6 }
 0x10a   :  { %984 = vrsqrt.f32 %v307_v9  ;;  %v539_v11 = vrot.slane %v538_v10, 1 }
 0x10c   :  { %v540_v12 = vadd.f32 %v539_v11, %v538_v10 }
 0x10e   :  { %v541_v13 = vmul.f32 0.125, %v540_v12 }
 0x110   :  { %v542_v14 = vadd.f32 1e-05, %v541_v13 }
 0x112   :  { %986 = vrsqrt.f32 %v542_v14 }
 0x117   :  { %v985_v15 = vpop.eup %984 }
 0x118   :  { %v309_v17 = vmul.f32 %v985_v15, %v297_v52 }
 0x11a   :  { %v316_v19 = vmul.f32 %v877_v16, %v309_v17  ;;  %v881_v17 = vld [vmem:[%s1324_s10] ss:$0 sm:$0xff]  ;;  %s1094_s10 = smov [#allocation8]  }
 0x11c   :  { %v323_v20 = vadd.f32 %v878_v18, %v316_v19 }
 0x11e   :  { %v324_v22 = vmax.f32 %v323_v20, 0.0 }
 0x11f   :  { %v987_v23 = vpop.eup %986 }
 0x120   :  { %v544_v24 = vmul.f32 %v987_v23, %v532_v61  ;;  %941 = vmatmul.mubr.msk.f32.vlgmr.msra.gmra.mxu0 %vm70_vm1, %v324_v22  ;;  %v882_v22 = vld [vmem:[%s1325_s11] ss:$0 sm:$0xff]  ;;  %s864_s11 = sshll.u32 %s1094_s10, 4  ;;  %s865_s11 = int_to_ptr.vmem [resolvable:$true] %s864_s11 }
 0x121   :  { %955 = vmatpush3.msra.mxu0 %v1215_v29  ;;  %962 = vmatprep.mubr.msk.f32.mxu0 %vm1093_vm0, %v1092_v0  ;;  %s1064_s15 = scalar_lea.vmem %s865_s11, 16  ;;  %s1068_s16 = scalar_lea.vmem %s865_s11, 32 }
 0x122   :  { %v545_v25 = vmul.f32 %v877_v16, %v544_v24  ;;  %956 = vmatprep.subr.mxu0 %v1092_v0  ;;  %p1065_p10 = scmp.ne.s32.totalorder %s865_s11, %s1064_s15  ;;  %p1069_p11 = scmp.lt.s32.totalorder %s865_s11, %s865_s11 }
 0x123   :  { %957 = vmatpush3.msra.mxu0 %v1221_v30  ;;  %v879_v30 = vld [vmem:[%s1323_s9] ss:$0 sm:$0xff]  ;;  %p1070_p12 = scmp.lt.s32.totalorder %s1068_s16, %s1064_s15 }
 0x124   :  { %v546_v26 = vadd.f32 %v878_v18, %v545_v25  ;;  %958 = vmatprep.subr.mxu0 %v1092_v0 }
 0x125   :  { %959 = vmatpush3.msra.mxu0 %v1230_v31  ;;  %p1071_p13 = por %p1070_p12, %p1069_p11 }
 0x126   :  { %v547_v27 = vmax.f32 %v546_v26, 0.0  ;;  %960 = vmatprep.subr.mxu0 %v1092_v0 }
 0x127   :  { %961 = vmatpush3.msra.mxu0 %v1237_v32  ;;  %p1072_p0 = pnand %p1071_p13, %p1065_p10 }
 0x128   :  { %963 = vmatmul.mubr.msk.f32.vlgmr.msra.gmra.mxu0 %vm70_vm1, %v547_v27 }
 0x190   :  { %v1267_v28 = vpop.f32.mrf.mxu0 }
 0x192   :  { %v919_v29 = vpop.f32.mrf.mxu0 }
 0x194   :  { %v1269_v33 = vpop.f32.mrf.mxu0 }
 0x196   :  { %v920_v34 = vpop.f32.mrf.mxu0 }
 0x1e0   :  { %v400_v35 = vpop.f32.mrf.mxu0 }
 0x1e1   :  { %v401_v36 = vadd.f32 %v879_v30, %v400_v35 }
 0x1e2   :  { %v942_v31 = vpop.f32.mrf.mxu0 }
 0x1e3   :  { %v404_v37 = vsel %vm148_vm2, %v401_v36, 0.0  ;;  %v139_v31 = vlaneseq }
 0x1e4   :  { %v405_v38 = vrot.slane %v404_v37, 4 }
 0x1e6   :  { %v406_v32 = vadd.f32 %v405_v38, %v404_v37  ;;  %v140_v37 = vshrl.u32 %v139_v31, 7  ;;  %v143_v38 = vand.u32 127, %v139_v31 }
 0x1e8   :  { %v407_v39 = vrot.slane %v406_v32, 2  ;;  %v617_v40 = vpop.f32.mrf.mxu0  ;;  %vm144_vm3 = vcmp.eq.s32.totalorder %v140_v37, %v143_v38 }
 0x1e9   :  { %v618_v41 = vadd.f32 %v879_v30, %v617_v40 }
 0x1ea   :  { %v408_v42 = vadd.f32 %v407_v39, %v406_v32  ;;  %v964_v43 = vpop.f32.mrf.mxu0  ;;  %v141_v32 = vadd.s32 8, %v140_v37 }
 0x1eb   :  { %v621_v44 = vsel %vm148_vm2, %v618_v41, 0.0 }
 0x1ec   :  { %v409_v45 = vrot.slane %v408_v42, 1  ;;  %v622_v46 = vrot.slane %v621_v44, 4  ;;  %vm145_vm4 = vcmp.eq.s32.totalorder %v141_v32, %v143_v38 }
 0x1ee   :  { %v410_v47 = vadd.f32 %v409_v45, %v408_v42  ;;  %v623_v48 = vadd.f32 %v622_v46, %v621_v44  ;;  %v147_v45 = vsel %vm145_vm4, -1e+09, %v1269_v33 }
 0x1ef   :  { %v152_v46 = vsel %vm148_vm2, %v147_v45, -inf }
 0x1f0   :  { %v411_v49 = vmul.f32 0.125, %v410_v47  ;;  %v624_v50 = vrot.slane %v623_v48, 2 }
 0x1f2   :  { %v412_v51 = vsub.f32 %v401_v36, %v411_v49  ;;  %v625_v52 = vadd.f32 %v624_v50, %v623_v48 }
 0x1f4   :  { %v413_v53 = vmul.f32 %v412_v51, %v412_v51  ;;  %v626_v54 = vrot.slane %v625_v52, 1 }
 0x1f6   :  { %v414_v55 = vsel %vm148_vm2, %v413_v53, 0.0  ;;  %v627_v56 = vadd.f32 %v626_v54, %v625_v52 }
 0x1f7   :  { %v415_v57 = vrot.slane %v414_v55, 4 }
 0x1f8   :  { %v628_v58 = vmul.f32 0.125, %v627_v56 }
 0x1f9   :  { %v416_v59 = vadd.f32 %v415_v57, %v414_v55 }
 0x1fa   :  { %v629_v60 = vsub.f32 %v618_v41, %v628_v58  ;;  %v146_v41 = vsel %vm144_vm3, -1e+09, %v1267_v28 }
 0x1fb   :  { %v417_v61 = vrot.slane %v416_v59, 2  ;;  %v149_v43 = vsel %vm148_vm2, %v146_v41, -inf }
 0x1fc   :  { %v630_v62 = vmul.f32 %v629_v60, %v629_v60 }
 0x1fd   :  { %v418_v63 = vadd.f32 %v417_v61, %v416_v59 }
 0x1fe   :  { %v631_v1 = vsel %vm148_vm2, %v630_v62, 0.0 }
 0x1ff   :  { %v419_v2 = vrot.slane %v418_v63, 1  ;;  %v632_v3 = vrot.slane %v631_v1, 4 }
 0x201   :  { %v420_v4 = vadd.f32 %v419_v2, %v418_v63  ;;  %v633_v5 = vadd.f32 %v632_v3, %v631_v1 }
 0x203   :  { %v421_v6 = vmul.f32 0.125, %v420_v4  ;;  %v634_v7 = vrot.slane %v633_v5, 2 }
 0x205   :  { %v635_v8 = vadd.f32 %v634_v7, %v633_v5  ;;  %v422_v9 = vadd.f32 1e-05, %v421_v6 }
 0x207   :  { %v636_v10 = vrot.slane %v635_v8, 1  ;;  %988 = vrsqrt.f32 %v422_v9 }
 0x209   :  { %v637_v11 = vadd.f32 %v636_v10, %v635_v8 }
 0x20b   :  { %v638_v12 = vmul.f32 0.125, %v637_v11 }
 0x20d   :  { %v639_v13 = vadd.f32 1e-05, %v638_v12 }
 0x20f   :  { %990 = vrsqrt.f32 %v639_v13  ;;  %v174_v13 = vsel %vm70_vm1, %v1208_v21, 0.0 }
 0x214   :  { %v989_v14 = vpop.eup %988 }
 0x215   :  { %v424_v15 = vmul.f32 %v989_v14, %v412_v51 }
 0x217   :  { %v431_v20 = vmul.f32 %v881_v17, %v424_v15 }
 0x219   :  { %v438_v25 = vadd.f32 %v882_v22, %v431_v20 }
 0x21b   :  { %v439_v26 = vsel %vm148_vm2, %v438_v25, -inf }
 0x21c   :  { %v991_v16 = vpop.eup %990 }
 0x21d   :  { %v641_v18 = vmul.f32 %v991_v16, %v629_v60 }
 0x21f   :  { %v642_v19 = vmul.f32 %v881_v17, %v641_v18 }
 0x221   :  { %v643_v23 = vadd.f32 %v882_v22, %v642_v19 }
 0x223   :  { %v644_v24 = vsel %vm148_vm2, %v643_v23, -inf }
 0x224   :  { %645 = vmax.xlane.f32.xlu1 %v644_v24 }
 0x228   :  { %440 = vmax.xlane.f32.xlu1 %v439_v26 }
 0x2ad   :  { %v646_v27 = vpop.xlane.xlu1 %645 }
 0x2ae   :  { %v647_v29 = vsub.f32 %v643_v23, %v646_v27 }
 0x2b0   :  { %v648_v34 = vmul.f32 1.442695, %v647_v29 }
 0x2b1   :  { %v441_v30 = vpop.xlane.xlu1 %440 }
 0x2b2   :  { %992 = vpow2.f32 %v648_v34  ;;  %v442_v35 = vsub.f32 %v438_v25, %v441_v30 }
 0x2b4   :  { %v443_v36 = vmul.f32 1.442695, %v442_v35 }
 0x2b6   :  { %994 = vpow2.f32 %v443_v36 }
 0x2bf   :  { %v993_v39 = vpop.eup %992 }
 0x2c0   :  { %v650_v40 = vsel %vm148_vm2, %v993_v39, 0.0 }
 0x2c1   :  { %651 = vadd.xlane.f32.xlu0 %v650_v40 }
 0x2c3   :  { %v995_v42 = vpop.eup %994 }
 0x2c4   :  { %v445_v44 = vsel %vm148_vm2, %v995_v42, 0.0 }
 0x2c5   :  { %150 = vmax.xlane.f32.xlu0 %v149_v43  ;;  %446 = vadd.xlane.f32.xlu1 %v445_v44 }
 0x2c9   :  { %153 = vmax.xlane.f32.xlu1 %v152_v46 }
 0x34a   :  { %v652_v47 = vpop.xlane.xlu0 %651 }
 0x34b   :  { %996 = vrcp.f32 %v652_v47 }
 0x34e   :  { %v447_v48 = vpop.xlane.xlu1 %446  ;;  %v1292_v49 = vpop.xlane.xlu0 %150 }
 0x34f   :  { %998 = vrcp.f32 %v447_v48  ;;  %v155_v28 = vsub.f32 %v146_v41, %v1292_v49 }
 0x351   :  { %v157_v52 = vmul.f32 1.442695, %v155_v28 }
 0x352   :  { %v154_v4 = vpop.xlane.xlu1 %153 }
 0x353   :  { %v156_v6 = vsub.f32 %v147_v45, %v154_v4 }
 0x355   :  { %v159_v8 = vmul.f32 1.442695, %v156_v6 }
 0x358   :  { %v997_v50 = vpop.eup %996 }
 0x359   :  { %v654_v51 = vmul.f32 %v997_v50, %v993_v39 }
 0x35b   :  { %1000 = vrcp.f32 %v654_v51 }
 0x35c   :  { %v999_v53 = vpop.eup %998  ;;  %1002 = vpow2.f32 %v157_v52 }
 0x35d   :  { %v449_v54 = vmul.f32 %v999_v53, %v995_v42 }
 0x35f   :  { %1004 = vrcp.f32 %v449_v54 }
 0x368   :  { %v1001_v33 = vpop.eup %1000 }
 0x369   :  { %966 = vmatpush3.xpose.msk.msra.mxu1 %vm148_vm2, %v1001_v33  ;;  %v827_v55 = vmul.f32 %v1001_v33, %v449_v54  ;;  %v1003_v56 = vpop.eup %1002 }
 0x36a   :  { %970 = vmatprep.subr.mxu1 %v1092_v0  ;;  %v161_v60 = vsel %vm148_vm2, %v1003_v56, 0.0 }
 0x36b   :  { %v828_v57 = vsel %vm148_vm2, %v827_v55, 0.0 }
 0x36c   :  { %v1005_v58 = vpop.eup %1004  ;;  %829 = vadd.xlane.f32.xlu1 %v828_v57  ;;  %968 = vmatmul.mubr.msk.f32.vlgmr.msra.gmra.mxu1 %vm148_vm2, %v449_v54 }
 0x36d   :  { %971 = vmatpush3.xpose.msk.msra.mxu1 %vm148_vm2, %v1005_v58  ;;  %972 = vmatprep.mubr.msk.f32.mxu1 %vm1093_vm0, %v1092_v0  ;;  %v831_v59 = vmul.f32 %v1005_v58, %v654_v51 }
 0x36f   :  { %v832_v10 = vsel %vm148_vm2, %v831_v59, 0.0 }
 0x370   :  { %162 = vadd.xlane.f32.xlu1 %v161_v60  ;;  %973 = vmatmul.mubr.msk.f32.vlgmr.msra.gmra.mxu1 %vm148_vm2, %v654_v51 }
 0x3f5   :  { %v830_v20 = vpop.xlane.xlu1 %829 }
 0x3f9   :  { %v163_v24 = vpop.xlane.xlu1 %162 }
 0x42c   :  { %v729_v61 = vpop.f32.mrf.mxu1 }
 0x42e   :  { %v969_v62 = vpop.f32.mrf.mxu1 }
 0x430   :  { %v805_v63 = vpop.f32.mrf.mxu1 }
 0x431   :  { %v809_v1 = vmul.f32 %v805_v63, %v729_v61 }
 0x432   :  { %v974_v2 = vpop.f32.mrf.mxu1 }
 0x433   :  { %1006 = vlog2.f32 %v809_v1 }
 0x440   :  { %v1007_v3 = vpop.eup %1006 }
 0x441   :  { %v811_v5 = vmul.f32 0.6931472, %v1007_v3 }
 0x443   :  { %v812_v7 = vadd.f32 1.0, %v811_v5 }
 0x445   :  { %1008 = vrcp.f32 %v812_v7 }
 0x446   :  { %1010 = vpow2.f32 %v159_v8 }
 0x452   :  { %v1009_v0 = vpop.eup %1008 }
 0x453   :  { %v815_v9 = vsel %vm814_vm5, %v1009_v0, -inf  ;;  %v1011_v11 = vpop.eup %1010 }
 0x454   :  { %816 = vmax.xlane.f32.xlu0 %v815_v9  ;;  %v164_v12 = vsel %vm148_vm2, %v1011_v11, 0.0 }
 0x458   :  { %833 = vadd.xlane.f32.xlu0 %v832_v10 }
 0x45c   :  { %165 = vadd.xlane.f32.xlu0 %v164_v12 }
 0x460   :  { %175 = vadd.xlane.f32.xlu0 %v174_v13 }
 0x4dd   :  { %v817_v14 = vpop.xlane.xlu0 %816 }
 0x4de   :  { %v818_v15 = vsub.f32 %v1009_v0, %v817_v14 }
 0x4e0   :  { %v819_v16 = vmul.f32 1.442695, %v818_v15 }
 0x4e1   :  { %v834_v19 = vpop.xlane.xlu0 %833 }
 0x4e2   :  { %1012 = vpow2.f32 %v819_v16  ;;  %v835_v22 = vmul.f32 %v834_v19, %v830_v20 }
 0x4e4   :  { %1014 = vlog2.f32 %v835_v22 }
 0x4e5   :  { %v166_v23 = vpop.xlane.xlu0 %165 }
 0x4e6   :  { %1016 = vlog2.f32 %v166_v23 }
 0x4e7   :  { %1018 = vlog2.f32 %v163_v24 }
 0x4e9   :  { %v176_v35 = vpop.xlane.xlu0 %175 }
 0x4ea   :  { %v177_v37 = vmul.f32 20.0, %v176_v35 }
 0x4ec   :  { %v185_v32 = vrot.slane %v177_v37, 4 }
 0x4ee   :  { %v186_v41 = vadd.f32 %v185_v32, %v177_v37 }
 0x4ef   :  { %v1013_v17 = vpop.eup %1012 }
 0x4f0   :  { %v821_v18 = vsel %vm814_vm5, %v1013_v17, 0.0  ;;  %v187_v44 = vrot.slane %v186_v41, 2 }
 0x4f1   :  { %822 = vadd.xlane.f32.xlu1 %v821_v18  ;;  %v1015_v25 = vpop.eup %1014 }
 0x4f2   :  { %v837_v26 = vmul.f32 0.6931472, %v1015_v25  ;;  %v188_v47 = vadd.f32 %v187_v44, %v186_v41 }
 0x4f3   :  { %v1017_v21 = vpop.eup %1016 }
 0x4f4   :  { %v1019_v27 = vpop.eup %1018  ;;  %v838_v29 = vadd.f32 1.0, %v837_v26  ;;  %v170_v34 = vmul.f32 0.6931472, %v1017_v21  ;;  %v189_v51 = vrot.slane %v188_v47, 1 }
 0x4f5   :  { %v168_v30 = vmul.f32 0.6931472, %v1019_v27 }
 0x4f6   :  { %1020 = vrcp.f32 %v838_v29  ;;  %v172_v36 = vadd.f32 %v170_v34, %v154_v4  ;;  %v190_v33 = vadd.f32 %v189_v51, %v188_v47 }
 0x4f7   :  { %v171_v31 = vadd.f32 %v168_v30, %v1292_v49 }
 0x4f8   :  { %v191_v59 = vmul.f32 2.0, %v190_v33 }
 0x4f9   :  { %v178_v38 = vadd.f32 %v172_v36, %v171_v31 }
 0x4fb   :  { %v179_v40 = vrot.slane %v178_v38, 4 }
 0x4fd   :  { %v180_v42 = vadd.f32 %v179_v40, %v178_v38 }
 0x4ff   :  { %v181_v45 = vrot.slane %v180_v42, 2 }
 0x501   :  { %v182_v48 = vadd.f32 %v181_v45, %v180_v42 }
 0x503   :  { %v1021_v43 = vpop.eup %1020  ;;  %v183_v53 = vrot.slane %v182_v48, 1 }
 0x504   :  { %v846_v46 = vrot.slane %v1021_v43, 4 }
 0x505   :  { %v184_v56 = vadd.f32 %v183_v53, %v182_v48 }
 0x506   :  { %v847_v28 = vadd.f32 %v1021_v43, %v846_v46 }
 0x507   :  { %v192_v61 = vsub.f32 %v184_v56, %v191_v59 }
 0x508   :  { %v848_v54 = vrot.slane %v847_v28, 2 }
 0x509   :  { %v193_v2 = vmul.f32 0.0625, %v192_v61 }
 0x50a   :  { %v849_v58 = vadd.f32 %v848_v54, %v847_v28 }
 0x50b   :  { %v854_v7 = vmul.f32 0.5, %v193_v2 }
 0x50c   :  { %v850_v63 = vrot.slane %v849_v58, 1 }
 0x50e   :  { %v851_v4 = vadd.f32 %v850_v63, %v849_v58 }
 0x57a   :  { %v823_v39 = vpop.xlane.xlu1 %822 }
 0x57b   :  { %1022 = vlog2.f32 %v823_v39 }
 0x588   :  { %v1023_v50 = vpop.eup %1022 }
 0x589   :  { %v825_v52 = vmul.f32 0.6931472, %v1023_v50 }
 0x58b   :  { %v826_v49 = vadd.f32 %v825_v52, %v817_v14 }
 0x58d   :  { %v840_v55 = vrot.slane %v826_v49, 4 }
 0x58f   :  { %v841_v57 = vadd.f32 %v840_v55, %v826_v49 }
 0x591   :  { %v842_v60 = vrot.slane %v841_v57, 2 }
 0x593   :  { %v843_v62 = vadd.f32 %v842_v60, %v841_v57 }
 0x595   :  { %v844_v1 = vrot.slane %v843_v62, 1 }
 0x597   :  { %v845_v3 = vadd.f32 %v844_v1, %v843_v62 }
 0x599   :  { %v852_v5 = vsub.f32 %v845_v3, %v851_v4 }
 0x59b   :  { %v853_v6 = vmul.f32 0.125, %v852_v5 }
 0x59d   :  { %v855_v8 = vadd.f32 %v854_v7, %v853_v6 }
 0x59f   :  { %857 = vst.msk [vmem:[#allocation8] sm:$0x1] %vm856_vm6, %v855_v8 }
 0x5a0   :  { %1075 = shalt.err (!%p1072_p0)
}
 0x5a1   :  { %867 = dma.vmem_to_hbm [thread:$0]  %s865_s11, 16, %s1326_s12, [#allocation5]  }
 0x5a2   :  { %1088 = dma.done.wait [#allocation5], 16  }
 0x5a3   :  { %1089 = vsyncadd [#allocation5], 4294967280 }
 0x5a4   :  { %871 = vsyncpa [#allocation4], 1 }
 0x5a5   :  { %872 = vsyncpa [#allocation7], 1 }
 0x5a6   :  { %873 = vsyncpa [#allocation5], 1 }

</bundles_post_ra>
